<compile_context>
chip_gen: v7x
topology: tpu7x:2x2x1
jax: 0.10.0
libtpu: 0.0.40
codegen_flags: <defaults>
</compile_context>

<pallas_src>
import functools

import jax
import jax.numpy as jnp
from jax.experimental import pallas as pl
from jax.experimental.pallas import tpu as pltpu

_LANE = 128
_SUBLANE = 8
_NEG_LARGE = -1e30  # finite "minus infinity" for padded logit lanes (avoids NaN paths)


def _round_up(n, m):
    return ((n + m - 1) // m) * m


def _cdiv(a, b):
    return -(-a // b)


# --------------------------------------------------------------------------- kernel

def _ff_kernel(*refs, num_hidden):
    # refs = (x, W1, b1, W2, b2, ..., W_out, b_out, out)
    x_ref = refs[0]
    out_ref = refs[-1]
    param_refs = refs[1:-1]

    h = x_ref[...]  # (TB, in_pad) f32 activation tile

    for li in range(num_hidden + 1):
        w = param_refs[2 * li][...]        # bf16 (fin_p, fout_p), VMEM-resident
        b = param_refs[2 * li + 1][...]    # f32  (1, fout_p)
        # bf16 MXU matmul, f32 accumulate; bias-add in f32.
        h = jnp.dot(h.astype(jnp.bfloat16), w,
                    preferred_element_type=jnp.float32) + b
        if li < num_hidden:
            h = jnp.maximum(h, 0.0)
            # TODO(synk): training-mode dropout would go here; eval mode = identity.

    # Padded output lanes already hold ~-1e30 (folded into the final padded bias),
    # so log_softmax over dim=1 ignores them with no explicit mask.
    m = jnp.max(h, axis=1, keepdims=True)
    shifted = h - m
    lse = jnp.log(jnp.sum(jnp.exp(shifted), axis=1, keepdims=True))
    out_ref[...] = (shifted - lse).astype(out_ref.dtype)


# --------------------------------------------------------------------------- wrapper

def prepare_ff_params(params):
    """Pad & cast parameters ONCE at model setup (hoisted out of the forward pass).

    params: list of (W, b), W: (fan_in, fan_out), b: (fan_out,) or (1, fan_out).
    Returns (flat, meta): flat = [W1(bf16), b1(f32), ...] with feature dims padded to
    multiples of 128 lanes. The final bias' padding columns are set to _NEG_LARGE so
    the kernel needs no explicit padded-logit mask.
    """
    nlayers = len(params)
    flat, feat_pads = [], []
    for idx, (w, b) in enumerate(params):
        fin, fout = w.shape
        fin_p, fout_p = _round_up(fin, _LANE), _round_up(fout, _LANE)
        w_p = (jnp.zeros((fin_p, fout_p), jnp.float32)
               .at[:fin, :fout].set(w.astype(jnp.float32))
               .astype(jnp.bfloat16))
        fill = _NEG_LARGE if idx == nlayers - 1 else 0.0
        b_p = (jnp.full((1, fout_p), fill, jnp.float32)
               .at[:, :fout].set(jnp.asarray(b, jnp.float32).reshape(1, -1)))
        flat += [w_p, b_p]
        feat_pads.append(fout_p)

    in_pad = _round_up(int(params[0][0].shape[0]), _LANE)
    meta = {
        "in_dim": int(params[0][0].shape[0]),
        "out_dim": int(params[-1][0].shape[1]),
        "num_hidden": nlayers - 1,
        "in_pad": in_pad,
        "out_pad": feat_pads[-1],
        "max_feat": max([in_pad] + feat_pads),
        "weight_bytes": int(sum(int(a.size) * a.dtype.itemsize for a in flat)),
    }
    return flat, meta


def _vmem_capacity_bytes():
    try:
        return int(pltpu.get_tpu_info().vmem_capacity_bytes)
    except Exception:
        return 64 << 20  # conservative default (v7x per-TensorCore VMEM)


_WEIGHT_SINGLE_BUFFER = None  # resolved (True/False) on the first forward call


def ff_classifier_forward(x, prepared, *, batch_tile=1024):
    """x: (B, input_size). prepared: output of prepare_ff_params(params)."""
    global _WEIGHT_SINGLE_BUFFER
    flat, meta = prepared
    in_dim, out_dim = meta["in_dim"], meta["out_dim"]
    in_pad, out_pad = meta["in_pad"], meta["out_pad"]
    num_hidden = meta["num_hidden"]
    max_feat = meta["max_feat"]
    weight_bytes = meta["weight_bytes"]

    B = x.shape[0]
    assert x.shape[1] == in_dim, "input feature size mismatch"

    # Balanced batch tiling: tb ~= ceil(B / num_tiles) rounded up to 8 sublanes, so a
    # ragged batch never wastes an almost-empty extra tile.
    num_tiles = max(1, _cdiv(B, max(batch_tile, _SUBLANE)))
    tb = _round_up(_cdiv(B, num_tiles), _SUBLANE)

    # Hardware-aware VMEM budget (v7x: 64 MiB/TC; v5e/v6e: 128 MiB).
    cap = max(_vmem_capacity_bytes() - (8 << 20), 16 << 20)

    def act_bytes(t):
        # double-buffered in/out tiles + live f32/bf16 intermediates (with slack)
        return 2 * t * in_pad * 4 + 2 * t * out_pad * 4 + 6 * t * max_feat * 4

    # 2x weight_bytes covers the double-buffered fallback path.
    while tb > _SUBLANE and 2 * weight_bytes + act_bytes(tb) > cap:
        tb = max(_SUBLANE, _round_up(tb // 2, _SUBLANE))

    b_pad = _round_up(B, tb)
    grid = (b_pad // tb,)
    vmem_limit = int(min(cap, max(2 * weight_bytes + act_bytes(tb) + (4 << 20),
                                  32 << 20)))

    # Skip the wrapper-side pad-copy when shapes are already aligned.
    if b_pad == B and in_pad == in_dim:
        x_in = x.astype(jnp.float32)
    else:
        x_in = (jnp.zeros((b_pad, in_pad), jnp.float32)
                .at[:B, :in_dim].set(x.astype(jnp.float32)))

    kernel = functools.partial(_ff_kernel, num_hidden=num_hidden)

    def run(single_buffer_weights):
        in_specs = [pl.BlockSpec((tb, in_pad), lambda i: (i, 0))]
        for arr in flat:
            if single_buffer_weights:
                # Constant index_map -> block never changes; one VMEM buffer suffices.
                in_specs.append(pl.BlockSpec(arr.shape, lambda i: (0, 0),
                                             pipeline_mode=pl.Buffered(1)))
            else:
                in_specs.append(pl.BlockSpec(arr.shape, lambda i: (0, 0)))
        return pl.pallas_call(
            kernel,
            out_shape=jax.ShapeDtypeStruct((b_pad, out_pad), jnp.float32),
            grid=grid,
            in_specs=in_specs,
            out_specs=pl.BlockSpec((tb, out_pad), lambda i: (i, 0)),
            compiler_params=pltpu.CompilerParams(
                dimension_semantics=("parallel",),
                vmem_limit_bytes=vmem_limit,
            ),
        )(x_in, *flat)

    if _WEIGHT_SINGLE_BUFFER is None:
        # Probe single-buffered resident weights once; cache the decision.
        try:
            out_padded = run(True)
            jax.block_until_ready(out_padded)
            _WEIGHT_SINGLE_BUFFER = True
        except Exception:
            _WEIGHT_SINGLE_BUFFER = False
            out_padded = run(False)
    else:
        out_padded = run(_WEIGHT_SINGLE_BUFFER)

    return out_padded[:B, :out_dim]


# --------------------------------------------------------------------------- utilities

def init_params(key, input_size, hidden_layer_sizes, output_size):
    """Deterministic PyTorch-Linear-style init: U(-1/sqrt(fan_in), 1/sqrt(fan_in))."""
    sizes = [input_size] + list(hidden_layer_sizes) + [output_size]
    params = []
    for fan_in, fan_out in zip(sizes[:-1], sizes[1:]):
        key, kw, kb = jax.random.split(key, 3)
        bound = 1.0 / jnp.sqrt(jnp.float32(fan_in))
        w = jax.random.uniform(kw, (fan_in, fan_out), jnp.float32, -bound, bound)
        b = jax.random.uniform(kb, (1, fan_out), jnp.float32, -bound, bound)
        params.append((w, b))
    return params


def reference_forward(x, params):
    h = x
    for w, b in params[:-1]:
        h = jnp.maximum(h @ w + b, 0.0)
    w, b = params[-1]
    logits = h @ w + b
    return jax.nn.log_softmax(logits, axis=1)


if __name__ == "__main__":
    input_size = 32
    hidden_layer_sizes = (64, 32)
    output_size = 10
    batch = 8

    key = jax.random.PRNGKey(0)
    key, kx = jax.random.split(key)
    x = jax.random.normal(kx, (batch, input_size), jnp.float32)
    params = init_params(key, input_size, hidden_layer_sizes, output_size)

    prepared = prepare_ff_params(params)        # pad/cast once at model setup
    out = ff_classifier_forward(x, prepared)
    out = jax.block_until_ready(out)

    ref = reference_forward(x, params)
    assert out.shape == (batch, output_size)
    # bf16 MXU operands (f32 accumulate) -> slightly loosened tolerance vs pure-f32 ref.
    assert jnp.allclose(out, ref, atol=5e-2, rtol=5e-2), "mismatch vs pure-JAX reference"

    print("KERNEL_OK")
</pallas_src>

<mosaic_0001>
module attributes {stable_mosaic.version = 11 : i64} {
  func.func @_ff_kernel(%arg0: i32, %arg1: memref<8x128xf32, #tpu.memory_space<vmem>>, %arg2: memref<128x128xbf16, #tpu.memory_space<vmem>>, %arg3: memref<1x128xf32, #tpu.memory_space<vmem>>, %arg4: memref<128x128xbf16, #tpu.memory_space<vmem>>, %arg5: memref<1x128xf32, #tpu.memory_space<vmem>>, %arg6: memref<128x128xbf16, #tpu.memory_space<vmem>>, %arg7: memref<1x128xf32, #tpu.memory_space<vmem>>, %arg8: memref<8x128xf32, #tpu.memory_space<vmem>>) attributes {dimension_semantics = [#tpu.dimension_semantics<parallel>], iteration_bounds = array<i64: 1>, scalar_prefetch = 0 : i64, scratch_operands = 0 : i64, tpu.core_type = #tpu.core_type<tc>, window_params = [{transform_indices = @transform_0, window_bounds = array<i64: 8, 128>}, {pipeline_mode = #tpu.pipeline_mode<synchronous>, transform_indices = @transform_1, window_bounds = array<i64: 128, 128>}, {pipeline_mode = #tpu.pipeline_mode<synchronous>, transform_indices = @transform_2, window_bounds = array<i64: 1, 128>}, {pipeline_mode = #tpu.pipeline_mode<synchronous>, transform_indices = @transform_3, window_bounds = array<i64: 128, 128>}, {pipeline_mode = #tpu.pipeline_mode<synchronous>, transform_indices = @transform_4, window_bounds = array<i64: 1, 128>}, {pipeline_mode = #tpu.pipeline_mode<synchronous>, transform_indices = @transform_5, window_bounds = array<i64: 128, 128>}, {pipeline_mode = #tpu.pipeline_mode<synchronous>, transform_indices = @transform_6, window_bounds = array<i64: 1, 128>}, {transform_indices = @transform_7, window_bounds = array<i64: 8, 128>}]} {
    %c0 = arith.constant 0 : index
    %c0_0 = arith.constant 0 : index
    %0 = vector.load %arg1[%c0, %c0_0] : memref<8x128xf32, #tpu.memory_space<vmem>>, vector<8x128xf32>
    %c0_1 = arith.constant 0 : index
    %c0_2 = arith.constant 0 : index
    %1 = vector.load %arg2[%c0_1, %c0_2] : memref<128x128xbf16, #tpu.memory_space<vmem>>, vector<128x128xbf16>
    %c0_3 = arith.constant 0 : index
    %c0_4 = arith.constant 0 : index
    %2 = vector.load %arg3[%c0_3, %c0_4] : memref<1x128xf32, #tpu.memory_space<vmem>>, vector<1x128xf32>
    %3 = arith.truncf %0 : vector<8x128xf32> to vector<8x128xbf16>
    %cst = arith.constant dense<0.000000e+00> : vector<8x128xf32>
    %4 = tpu.matmul %3, %1, %cst {dimension_numbers = #tpu.dot_dimension_numbers<[1], [0], [0], [1], [0, 0, 1, 1], [], []>} : vector<8x128xbf16>, vector<128x128xbf16>, vector<8x128xf32> -> vector<8x128xf32>
    %5 = vector.broadcast %2 : vector<1x128xf32> to vector<8x128xf32>
    %6 = arith.addf %4, %5 : vector<8x128xf32>
    %cst_5 = arith.constant 0.000000e+00 : f32
    %7 = vector.broadcast %cst_5 : f32 to vector<8x128xf32>
    %8 = arith.maximumf %6, %7 : vector<8x128xf32>
    %c0_6 = arith.constant 0 : index
    %c0_7 = arith.constant 0 : index
    %9 = vector.load %arg4[%c0_6, %c0_7] : memref<128x128xbf16, #tpu.memory_space<vmem>>, vector<128x128xbf16>
    %c0_8 = arith.constant 0 : index
    %c0_9 = arith.constant 0 : index
    %10 = vector.load %arg5[%c0_8, %c0_9] : memref<1x128xf32, #tpu.memory_space<vmem>>, vector<1x128xf32>
    %11 = arith.truncf %8 : vector<8x128xf32> to vector<8x128xbf16>
    %cst_10 = arith.constant dense<0.000000e+00> : vector<8x128xf32>
    %12 = tpu.matmul %11, %9, %cst_10 {dimension_numbers = #tpu.dot_dimension_numbers<[1], [0], [0], [1], [0, 0, 1, 1], [], []>} : vector<8x128xbf16>, vector<128x128xbf16>, vector<8x128xf32> -> vector<8x128xf32>
    %13 = vector.broadcast %10 : vector<1x128xf32> to vector<8x128xf32>
    %14 = arith.addf %12, %13 : vector<8x128xf32>
    %cst_11 = arith.constant 0.000000e+00 : f32
    %15 = vector.broadcast %cst_11 : f32 to vector<8x128xf32>
    %16 = arith.maximumf %14, %15 : vector<8x128xf32>
    %c0_12 = arith.constant 0 : index
    %c0_13 = arith.constant 0 : index
    %17 = vector.load %arg6[%c0_12, %c0_13] : memref<128x128xbf16, #tpu.memory_space<vmem>>, vector<128x128xbf16>
    %c0_14 = arith.constant 0 : index
    %c0_15 = arith.constant 0 : index
    %18 = vector.load %arg7[%c0_14, %c0_15] : memref<1x128xf32, #tpu.memory_space<vmem>>, vector<1x128xf32>
    %19 = arith.truncf %16 : vector<8x128xf32> to vector<8x128xbf16>
    %cst_16 = arith.constant dense<0.000000e+00> : vector<8x128xf32>
    %20 = tpu.matmul %19, %17, %cst_16 {dimension_numbers = #tpu.dot_dimension_numbers<[1], [0], [0], [1], [0, 0, 1, 1], [], []>} : vector<8x128xbf16>, vector<128x128xbf16>, vector<8x128xf32> -> vector<8x128xf32>
    %21 = vector.broadcast %18 : vector<1x128xf32> to vector<8x128xf32>
    %22 = arith.addf %20, %21 : vector<8x128xf32>
    %cst_17 = arith.constant dense<0xFF800000> : vector<8xf32>
    %23 = vector.multi_reduction <maximumf>, %22, %cst_17 [1] : vector<8x128xf32> to vector<8xf32>
    %24 = vector.shape_cast %23 : vector<8xf32> to vector<8x1xf32>
    %25 = vector.broadcast %24 : vector<8x1xf32> to vector<8x128xf32>
    %26 = arith.subf %22, %25 : vector<8x128xf32>
    %27 = math.exp %26 : vector<8x128xf32>
    %cst_18 = arith.constant dense<0.000000e+00> : vector<8xf32>
    %28 = vector.multi_reduction <add>, %27, %cst_18 [1] : vector<8x128xf32> to vector<8xf32>
    %29 = vector.shape_cast %28 : vector<8xf32> to vector<8x1xf32>
    %30 = math.log %29 : vector<8x1xf32>
    %31 = vector.broadcast %30 : vector<8x1xf32> to vector<8x128xf32>
    %32 = arith.subf %26, %31 : vector<8x128xf32>
    %c0_19 = arith.constant 0 : index
    %c0_20 = arith.constant 0 : index
    %33 = vector.load %arg8[%c0_19, %c0_20] : memref<8x128xf32, #tpu.memory_space<vmem>>, vector<8x128xf32>
    tpu.vector_store %arg8[%c0_19, %c0_20], %32 {strides = array<i32>} : memref<8x128xf32, #tpu.memory_space<vmem>>, vector<8x128xf32>,
    return
  }
  func.func @transform_0(%arg0: i32) -> (i32, i32) {
    %c0_i32 = arith.constant 0 : i32
    %c0_i32_0 = arith.constant 0 : i32
    return %arg0, %c0_i32 : i32, i32
  }
  func.func @transform_1(%arg0: i32) -> (i32, i32) {
    %c0_i32 = arith.constant 0 : i32
    %c0_i32_0 = arith.constant 0 : i32
    %c0_i32_1 = arith.constant 0 : i32
    return %c0_i32, %c0_i32_0 : i32, i32
  }
  func.func @transform_2(%arg0: i32) -> (i32, i32) {
    %c0_i32 = arith.constant 0 : i32
    %c0_i32_0 = arith.constant 0 : i32
    %c0_i32_1 = arith.constant 0 : i32
    return %c0_i32, %c0_i32_0 : i32, i32
  }
  func.func @transform_3(%arg0: i32) -> (i32, i32) {
    %c0_i32 = arith.constant 0 : i32
    %c0_i32_0 = arith.constant 0 : i32
    %c0_i32_1 = arith.constant 0 : i32
    return %c0_i32, %c0_i32_0 : i32, i32
  }
  func.func @transform_4(%arg0: i32) -> (i32, i32) {
    %c0_i32 = arith.constant 0 : i32
    %c0_i32_0 = arith.constant 0 : i32
    %c0_i32_1 = arith.constant 0 : i32
    return %c0_i32, %c0_i32_0 : i32, i32
  }
  func.func @transform_5(%arg0: i32) -> (i32, i32) {
    %c0_i32 = arith.constant 0 : i32
    %c0_i32_0 = arith.constant 0 : i32
    %c0_i32_1 = arith.constant 0 : i32
    return %c0_i32, %c0_i32_0 : i32, i32
  }
  func.func @transform_6(%arg0: i32) -> (i32, i32) {
    %c0_i32 = arith.constant 0 : i32
    %c0_i32_0 = arith.constant 0 : i32
    %c0_i32_1 = arith.constant 0 : i32
    return %c0_i32, %c0_i32_0 : i32, i32
  }
  func.func @transform_7(%arg0: i32) -> (i32, i32) {
    %c0_i32 = arith.constant 0 : i32
    %c0_i32_0 = arith.constant 0 : i32
    return %arg0, %c0_i32 : i32, i32
  }
}

module attributes {stable_mosaic.version = 11 : i64} {
  func.func @_ff_kernel(%arg0: i32, %arg1: memref<8x128xf32, #tpu.memory_space<vmem>>, %arg2: memref<128x128xbf16, #tpu.memory_space<vmem>>, %arg3: memref<1x128xf32, #tpu.memory_space<vmem>>, %arg4: memref<128x128xbf16, #tpu.memory_space<vmem>>, %arg5: memref<1x128xf32, #tpu.memory_space<vmem>>, %arg6: memref<128x128xbf16, #tpu.memory_space<vmem>>, %arg7: memref<1x128xf32, #tpu.memory_space<vmem>>, %arg8: memref<8x128xf32, #tpu.memory_space<vmem>>) attributes {dimension_semantics = [#tpu.dimension_semantics<parallel>], iteration_bounds = array<i64: 1>, scalar_prefetch = 0 : i64, scratch_operands = 0 : i64, tpu.core_type = #tpu.core_type<tc>, window_params = [{transform_indices = @transform_0, window_bounds = array<i64: 8, 128>}, {pipeline_mode = #tpu.pipeline_mode<synchronous>, transform_indices = @transform_1, window_bounds = array<i64: 128, 128>}, {pipeline_mode = #tpu.pipeline_mode<synchronous>, transform_indices = @transform_2, window_bounds = array<i64: 1, 128>}, {pipeline_mode = #tpu.pipeline_mode<synchronous>, transform_indices = @transform_3, window_bounds = array<i64: 128, 128>}, {pipeline_mode = #tpu.pipeline_mode<synchronous>, transform_indices = @transform_4, window_bounds = array<i64: 1, 128>}, {pipeline_mode = #tpu.pipeline_mode<synchronous>, transform_indices = @transform_5, window_bounds = array<i64: 128, 128>}, {pipeline_mode = #tpu.pipeline_mode<synchronous>, transform_indices = @transform_6, window_bounds = array<i64: 1, 128>}, {transform_indices = @transform_7, window_bounds = array<i64: 8, 128>}]} {
    %c0 = arith.constant 0 : index
    %c0_0 = arith.constant 0 : index
    %0 = vector.load %arg1[%c0, %c0_0] : memref<8x128xf32, #tpu.memory_space<vmem>>, vector<8x128xf32>
    %c0_1 = arith.constant 0 : index
    %c0_2 = arith.constant 0 : index
    %1 = vector.load %arg2[%c0_1, %c0_2] : memref<128x128xbf16, #tpu.memory_space<vmem>>, vector<128x128xbf16>
    %c0_3 = arith.constant 0 : index
    %c0_4 = arith.constant 0 : index
    %2 = vector.load %arg3[%c0_3, %c0_4] : memref<1x128xf32, #tpu.memory_space<vmem>>, vector<1x128xf32>
    %3 = arith.truncf %0 : vector<8x128xf32> to vector<8x128xbf16>
    %cst = arith.constant dense<0.000000e+00> : vector<8x128xf32>
    %4 = tpu.matmul %3, %1, %cst {dimension_numbers = #tpu.dot_dimension_numbers<[1], [0], [0], [1], [0, 0, 1, 1], [], []>} : vector<8x128xbf16>, vector<128x128xbf16>, vector<8x128xf32> -> vector<8x128xf32>
    %5 = vector.broadcast %2 : vector<1x128xf32> to vector<8x128xf32>
    %6 = arith.addf %4, %5 : vector<8x128xf32>
    %cst_5 = arith.constant 0.000000e+00 : f32
    %7 = vector.broadcast %cst_5 : f32 to vector<8x128xf32>
    %8 = arith.maximumf %6, %7 : vector<8x128xf32>
    %c0_6 = arith.constant 0 : index
    %c0_7 = arith.constant 0 : index
    %9 = vector.load %arg4[%c0_6, %c0_7] : memref<128x128xbf16, #tpu.memory_space<vmem>>, vector<128x128xbf16>
    %c0_8 = arith.constant 0 : index
    %c0_9 = arith.constant 0 : index
    %10 = vector.load %arg5[%c0_8, %c0_9] : memref<1x128xf32, #tpu.memory_space<vmem>>, vector<1x128xf32>
    %11 = arith.truncf %8 : vector<8x128xf32> to vector<8x128xbf16>
    %cst_10 = arith.constant dense<0.000000e+00> : vector<8x128xf32>
    %12 = tpu.matmul %11, %9, %cst_10 {dimension_numbers = #tpu.dot_dimension_numbers<[1], [0], [0], [1], [0, 0, 1, 1], [], []>} : vector<8x128xbf16>, vector<128x128xbf16>, vector<8x128xf32> -> vector<8x128xf32>
    %13 = vector.broadcast %10 : vector<1x128xf32> to vector<8x128xf32>
    %14 = arith.addf %12, %13 : vector<8x128xf32>
    %cst_11 = arith.constant 0.000000e+00 : f32
    %15 = vector.broadcast %cst_11 : f32 to vector<8x128xf32>
    %16 = arith.maximumf %14, %15 : vector<8x128xf32>
    %c0_12 = arith.constant 0 : index
    %c0_13 = arith.constant 0 : index
    %17 = vector.load %arg6[%c0_12, %c0_13] : memref<128x128xbf16, #tpu.memory_space<vmem>>, vector<128x128xbf16>
    %c0_14 = arith.constant 0 : index
    %c0_15 = arith.constant 0 : index
    %18 = vector.load %arg7[%c0_14, %c0_15] : memref<1x128xf32, #tpu.memory_space<vmem>>, vector<1x128xf32>
    %19 = arith.truncf %16 : vector<8x128xf32> to vector<8x128xbf16>
    %cst_16 = arith.constant dense<0.000000e+00> : vector<8x128xf32>
    %20 = tpu.matmul %19, %17, %cst_16 {dimension_numbers = #tpu.dot_dimension_numbers<[1], [0], [0], [1], [0, 0, 1, 1], [], []>} : vector<8x128xbf16>, vector<128x128xbf16>, vector<8x128xf32> -> vector<8x128xf32>
    %21 = vector.broadcast %18 : vector<1x128xf32> to vector<8x128xf32>
    %22 = arith.addf %20, %21 : vector<8x128xf32>
    %cst_17 = arith.constant dense<0xFF800000> : vector<8xf32>
    %23 = vector.multi_reduction <maximumf>, %22, %cst_17 [1] : vector<8x128xf32> to vector<8xf32>
    %24 = vector.shape_cast %23 : vector<8xf32> to vector<8x1xf32>
    %25 = vector.broadcast %24 : vector<8x1xf32> to vector<8x128xf32>
    %26 = arith.subf %22, %25 : vector<8x128xf32>
    %27 = math.exp %26 : vector<8x128xf32>
    %cst_18 = arith.constant dense<0.000000e+00> : vector<8xf32>
    %28 = vector.multi_reduction <add>, %27, %cst_18 [1] : vector<8x128xf32> to vector<8xf32>
    %29 = vector.shape_cast %28 : vector<8xf32> to vector<8x1xf32>
    %30 = math.log %29 : vector<8x1xf32>
    %31 = vector.broadcast %30 : vector<8x1xf32> to vector<8x128xf32>
    %32 = arith.subf %26, %31 : vector<8x128xf32>
    %c0_19 = arith.constant 0 : index
    %c0_20 = arith.constant 0 : index
    %33 = vector.load %arg8[%c0_19, %c0_20] : memref<8x128xf32, #tpu.memory_space<vmem>>, vector<8x128xf32>
    tpu.vector_store %arg8[%c0_19, %c0_20], %32 {strides = array<i32>} : memref<8x128xf32, #tpu.memory_space<vmem>>, vector<8x128xf32>,
    return
  }
  func.func @transform_0(%arg0: i32) -> (i32, i32) {
    %c0_i32 = arith.constant 0 : i32
    %c0_i32_0 = arith.constant 0 : i32
    return %arg0, %c0_i32 : i32, i32
  }
  func.func @transform_1(%arg0: i32) -> (i32, i32) {
    %c0_i32 = arith.constant 0 : i32
    %c0_i32_0 = arith.constant 0 : i32
    %c0_i32_1 = arith.constant 0 : i32
    return %c0_i32, %c0_i32_0 : i32, i32
  }
  func.func @transform_2(%arg0: i32) -> (i32, i32) {
    %c0_i32 = arith.constant 0 : i32
    %c0_i32_0 = arith.constant 0 : i32
    %c0_i32_1 = arith.constant 0 : i32
    return %c0_i32, %c0_i32_0 : i32, i32
  }
  func.func @transform_3(%arg0: i32) -> (i32, i32) {
    %c0_i32 = arith.constant 0 : i32
    %c0_i32_0 = arith.constant 0 : i32
    %c0_i32_1 = arith.constant 0 : i32
    return %c0_i32, %c0_i32_0 : i32, i32
  }
  func.func @transform_4(%arg0: i32) -> (i32, i32) {
    %c0_i32 = arith.constant 0 : i32
    %c0_i32_0 = arith.constant 0 : i32
    %c0_i32_1 = arith.constant 0 : i32
    return %c0_i32, %c0_i32_0 : i32, i32
  }
  func.func @transform_5(%arg0: i32) -> (i32, i32) {
    %c0_i32 = arith.constant 0 : i32
    %c0_i32_0 = arith.constant 0 : i32
    %c0_i32_1 = arith.constant 0 : i32
    return %c0_i32, %c0_i32_0 : i32, i32
  }
  func.func @transform_6(%arg0: i32) -> (i32, i32) {
    %c0_i32 = arith.constant 0 : i32
    %c0_i32_0 = arith.constant 0 : i32
    %c0_i32_1 = arith.constant 0 : i32
    return %c0_i32, %c0_i32_0 : i32, i32
  }
  func.func @transform_7(%arg0: i32) -> (i32, i32) {
    %c0_i32 = arith.constant 0 : i32
    %c0_i32_0 = arith.constant 0 : i32
    return %arg0, %c0_i32 : i32, i32
  }
}

</mosaic_0001>

<bundles_post_ra>
// kernel: tpu_custom_call.1
= control target key start
LH: loop header
LB: loop body
LE: loop exit
PB: predicated region body
PF: predicated region fallthrough
CT: control target
= control target key end

     0   :  { %12 = vsyncpa [#allocation3], 0  ;;  %s874_s0 = inlined_call_operand.hbm [shape: f32[8,128], index: 0, kind: input, shape index: {}]   ;;  %s875_s1 = inlined_call_operand.hbm [shape: bf16[128,128], index: 1, kind: input, shape index: {}]   ;;  %s876_s2 = inlined_call_operand.vmem [shape: f32[1,128], index: 2, kind: input, shape index: {}]   ;;  %s877_s3 = inlined_call_operand.hbm [shape: bf16[128,128], index: 3, kind: input, shape index: {}]   ;;  %s878_s4 = inlined_call_operand.vmem [shape: f32[1,128], index: 4, kind: input, shape index: {}]   ;;  %s879_s5 = inlined_call_operand.hbm [shape: bf16[128,128], index: 5, kind: input, shape index: {}]   ;;  %s880_s6 = inlined_call_operand.vmem [shape: f32[1,128], index: 6, kind: input, shape index: {}]   ;;  %s881_s7 = inlined_call_operand.hbm [shape: f32[8,128], index: 7, kind: output, shape index: {}]  }
   0x1   :  { %13 = vsyncpa [#allocation6], 0 }
   0x2   :  { %14 = vsyncpa [#allocation9], 0 }
   0x3   :  { %15 = vsyncpa [#allocation4], 0  ;;  %s717_s24 = smov [#allocation5]   ;;  %s599_s28 = scalar_lea.hbm %s875_s1, 1024 }
   0x4   :  { %s31_s25 = sshll.u32 %s717_s24, 4  ;;  %p600_p0 = scmp.ne.s32.totalorder %s875_s1, %s599_s28  ;;  %s32_s25 = int_to_ptr.vmem [resolvable:$true] %s31_s25 }
   0x5   :  { %p603_p1 = scmp.lt.u32.totalorder %s599_s28, %s875_s1 }
   0x7   :  { %p605_p2 = pnand %p603_p1, %p600_p0 }
   0x9   :  { %608 = shalt.err (!%p605_p2)
}
   0xa   :  { %s609_s10 = scalar_lea.vmem %s32_s25, 1024  ;;  %p614_p4 = scmp.lt.s32.totalorder %s32_s25, %s32_s25 }
   0xb   :  { %p610_p3 = scmp.ne.s32.totalorder %s32_s25, %s609_s10  ;;  %p615_p5 = scmp.lt.s32.totalorder %s609_s10, %s609_s10 }
   0xd   :  { %p616_p6 = por %p615_p5, %p614_p4 }
   0xf   :  { %p617_p7 = pnand %p616_p6, %p610_p3 }
  0x11   :  { %620 = shalt.err (!%p617_p7)
}
  0x12   :  { %s718_s11 = smov 64   ;;  %s719_s12 = smov 4  }
  0x13   :  { %37 = dma.hbm_to_vmem [thread:$0]  %s875_s1, 1024, %s32_s25, [#allocation6], %s718_s11, %s718_s11, %s719_s12  }
  0x14   :  { %s720_s15 = smov [#allocation2]   ;;  %s721_s17 = smov [#allocation7]  }
  0x15   :  { %s22_s16 = sshll.u32 %s720_s15, 4  ;;  %s45_s18 = sshll.u32 %s721_s17, 4  ;;  %s23_s16 = int_to_ptr.vmem [resolvable:$true] %s22_s16  ;;  %s46_s18 = int_to_ptr.vmem [resolvable:$true] %s45_s18 }
  0x16   :  { %s621_s21 = scalar_lea.hbm %s874_s0, 128 }
  0x17   :  { %p622_p8 = scmp.ne.s32.totalorder %s874_s0, %s621_s21  ;;  %p625_p9 = scmp.lt.u32.totalorder %s621_s21, %s874_s0 }
  0x19   :  { %p627_p10 = pnand %p625_p9, %p622_p8 }
  0x1b   :  { %630 = shalt.err (!%p627_p10)
}
  0x1c   :  { %s631_s1 = scalar_lea.vmem %s23_s16, 128  ;;  %p636_p12 = scmp.lt.s32.totalorder %s23_s16, %s23_s16 }
  0x1d   :  { %p632_p11 = scmp.ne.s32.totalorder %s23_s16, %s631_s1  ;;  %p637_p13 = scmp.lt.s32.totalorder %s631_s1, %s631_s1 }
  0x1f   :  { %p638_p0 = por %p637_p13, %p636_p12 }
  0x21   :  { %p639_p1 = pnand %p638_p0, %p632_p11 }
  0x23   :  { %642 = shalt.err (!%p639_p1)
}
  0x24   :  { %25 = dma.hbm_to_vmem [thread:$0]  %s874_s0, 128, %s23_s16, [#allocation3]  }
  0x25   :  { %s643_s30 = scalar_lea.hbm %s877_s3, 1024 }
  0x26   :  { %p644_p2 = scmp.ne.s32.totalorder %s877_s3, %s643_s30  ;;  %p647_p3 = scmp.lt.u32.totalorder %s643_s30, %s877_s3 }
  0x28   :  { %p649_p4 = pnand %p647_p3, %p644_p2 }
  0x2a   :  { %652 = shalt.err (!%p649_p4)
}
  0x2b   :  { %s653_s14 = scalar_lea.vmem %s46_s18, 1024  ;;  %p658_p6 = scmp.lt.s32.totalorder %s46_s18, %s46_s18 }
  0x2c   :  { %p654_p5 = scmp.ne.s32.totalorder %s46_s18, %s653_s14  ;;  %p659_p7 = scmp.lt.s32.totalorder %s653_s14, %s653_s14 }
  0x2e   :  { %p660_p8 = por %p659_p7, %p658_p6 }
  0x30   :  { %p661_p9 = pnand %p660_p8, %p654_p5 }
  0x32   :  { %664 = shalt.err (!%p661_p9)
}
  0x33   :  { %51 = dma.hbm_to_vmem [thread:$0]  %s877_s3, 1024, %s46_s18, [#allocation6], %s718_s11, %s718_s11, %s719_s12  }
  0x34   :  { %s722_s16 = smov [#allocation8]   ;;  %s665_s21 = scalar_lea.hbm %s879_s5, 1024 }
  0x35   :  { %s59_s17 = sshll.u32 %s722_s16, 4  ;;  %p666_p10 = scmp.ne.s32.totalorder %s879_s5, %s665_s21  ;;  %s60_s17 = int_to_ptr.vmem [resolvable:$true] %s59_s17 }
  0x36   :  { %p669_p11 = scmp.lt.u32.totalorder %s665_s21, %s879_s5 }
  0x38   :  { %p671_p12 = pnand %p669_p11, %p666_p10 }
  0x3a   :  { %674 = shalt.err (!%p671_p12)
}
  0x3b   :  { %s675_s1 = scalar_lea.vmem %s60_s17, 1024  ;;  %p680_p0 = scmp.lt.s32.totalorder %s60_s17, %s60_s17 }
  0x3c   :  { %p676_p13 = scmp.ne.s32.totalorder %s60_s17, %s675_s1  ;;  %p681_p1 = scmp.lt.s32.totalorder %s675_s1, %s675_s1 }
  0x3e   :  { %p682_p2 = por %p681_p1, %p680_p0 }
  0x40   :  { %p683_p3 = pnand %p682_p2, %p676_p13 }
  0x42   :  { %686 = shalt.err (!%p683_p3)
}
  0x43   :  { %65 = dma.hbm_to_vmem [thread:$0]  %s879_s5, 1024, %s60_s17, [#allocation9], %s718_s11, %s718_s11, %s719_s12  }
  0x44   :  { %709 = dma.done.wait [#allocation3], 128  }
  0x45   :  { %710 = vsyncadd [#allocation3], 4294967168 }
  0x46   :  { %711 = dma.done.wait [#allocation6], 2048  }
  0x47   :  { %712 = vsyncadd [#allocation6], 4294965248 }
  0x48   :  { %713 = dma.done.wait [#allocation9], 1024  }
  0x49   :  { %714 = vsyncadd [#allocation9], 4294966272  ;;  %v723_v0 = vmov 0.0   ;;  %vm724_vm0 = vmmov 0   ;;  %v571_v1 = vld [vmem:[#allocation5] sm:$0xff]   ;;  %v572_v2 = vld [vmem:[#allocation5 + $0x8] sm:$0xff]  }
  0x4a   :  { %502 = vmatprep.subr.bf16.mxu0 %v723_v0  ;;  %518 = vmatprep.mubr.msk.bf16.mxu0 %vm724_vm0, %v723_v0  ;;  %v573_v3 = vld [vmem:[#allocation5 + $0x10] sm:$0xff]   ;;  %v579_v4 = vld [vmem:[#allocation7] sm:$0xff]   ;;  %v574_v5 = vld [vmem:[#allocation5 + $0x18] sm:$0xff]  }
  0x4b   :  { %522 = vmatprep.subr.bf16.mxu1 %v723_v0  ;;  %538 = vmatprep.mubr.msk.bf16.mxu1 %vm724_vm0, %v723_v0  ;;  %v580_v6 = vld [vmem:[#allocation7 + $0x8] sm:$0xff]   ;;  %v575_v7 = vld [vmem:[#allocation5 + $0x20] sm:$0xff]   ;;  %v581_v8 = vld [vmem:[#allocation7 + $0x10] sm:$0xff]  }
  0x4c   :  { %503 = vmatpush3.bf16.msra.mxu0 %v571_v1  ;;  %523 = vmatpush3.bf16.msra.mxu1 %v579_v4  ;;  %v576_v9 = vld [vmem:[#allocation5 + $0x28] sm:$0xff]   ;;  %v582_v10 = vld [vmem:[#allocation7 + $0x18] sm:$0xff]   ;;  %v577_v11 = vld [vmem:[#allocation5 + $0x30] sm:$0xff]  }
  0x4d   :  { %504 = vmatprep.subr.bf16.mxu0 %v723_v0  ;;  %524 = vmatprep.subr.bf16.mxu1 %v723_v0  ;;  %v583_v12 = vld [vmem:[#allocation7 + $0x20] sm:$0xff]   ;;  %v578_v13 = vld [vmem:[#allocation5 + $0x38] sm:$0xff]   ;;  %v584_v15 = vld [vmem:[#allocation7 + $0x28] sm:$0xff]  }
  0x4e   :  { %v81_v14 = vld [vmem:[#allocation2] sm:$0xff]  ;;  %v585_v17 = vld [vmem:[#allocation7 + $0x30] sm:$0xff]   ;;  %v587_v19 = vld [vmem:[#allocation8] sm:$0xff]  }
  0x4f   :  { %v99_v16 = vpack.c.bf16 %v81_v14, %v81_v14  ;;  %v586_v18 = vld [vmem:[#allocation7 + $0x38] sm:$0xff]   ;;  %v588_v20 = vld [vmem:[#allocation8 + $0x8] sm:$0xff]   ;;  %v589_v21 = vld [vmem:[#allocation8 + $0x10] sm:$0xff]  }
  0x50   :  { %505 = vmatpush3.bf16.msra.mxu0 %v572_v2  ;;  %525 = vmatpush3.bf16.msra.mxu1 %v580_v6  ;;  %v590_v22 = vld [vmem:[#allocation8 + $0x18] sm:$0xff]   ;;  %v591_v23 = vld [vmem:[#allocation8 + $0x20] sm:$0xff]   ;;  %v592_v24 = vld [vmem:[#allocation8 + $0x28] sm:$0xff]  }
  0x51   :  { %506 = vmatprep.subr.bf16.mxu0 %v723_v0  ;;  %526 = vmatprep.subr.bf16.mxu1 %v723_v0  ;;  %v448_v25 = vld [vmem:[%s876_s2] ss:$0 sm:$0xff]  ;;  %v593_v33 = vld [vmem:[#allocation8 + $0x30] sm:$0xff]  }
  0x52   :  { %v594_v34 = vld [vmem:[#allocation8 + $0x38] sm:$0xff]  }
  0x53   :  { %v457_v35 = vld [vmem:[%s878_s4] ss:$0 sm:$0xff]  ;;  %s725_s4 = smov [#allocation10]  }
  0x54   :  { %507 = vmatpush3.bf16.msra.mxu0 %v573_v3  ;;  %527 = vmatpush3.bf16.msra.mxu1 %v581_v8  ;;  %v466_v43 = vld [vmem:[%s880_s6] ss:$0 sm:$0xff]  ;;  %s437_s28 = sshll.u32 %s725_s4, 4  ;;  %s438_s28 = int_to_ptr.vmem [resolvable:$true] %s437_s28 }
  0x55   :  { %508 = vmatprep.subr.bf16.mxu0 %v723_v0  ;;  %528 = vmatprep.subr.bf16.mxu1 %v723_v0  ;;  %s687_s6 = scalar_lea.vmem %s438_s28, 128  ;;  %p692_p5 = scmp.lt.s32.totalorder %s438_s28, %s438_s28 }
  0x56   :  { %p688_p4 = scmp.ne.s32.totalorder %s438_s28, %s687_s6  ;;  %p693_p6 = scmp.lt.s32.totalorder %s687_s6, %s687_s6 }
  0x58   :  { %509 = vmatpush3.bf16.msra.mxu0 %v574_v5  ;;  %529 = vmatpush3.bf16.msra.mxu1 %v582_v10  ;;  %p694_p7 = por %p693_p6, %p692_p5 }
  0x59   :  { %510 = vmatprep.subr.bf16.mxu0 %v723_v0  ;;  %530 = vmatprep.subr.bf16.mxu1 %v723_v0 }
  0x5a   :  { %p695_p8 = pnand %p694_p7, %p688_p4 }
  0x5c   :  { %511 = vmatpush3.bf16.msra.mxu0 %v575_v7  ;;  %531 = vmatpush3.bf16.msra.mxu1 %v583_v12 }
  0x5d   :  { %512 = vmatprep.subr.bf16.mxu0 %v723_v0  ;;  %532 = vmatprep.subr.bf16.mxu1 %v723_v0 }
  0x60   :  { %513 = vmatpush3.bf16.msra.mxu0 %v576_v9  ;;  %533 = vmatpush3.bf16.msra.mxu1 %v584_v15 }
  0x61   :  { %514 = vmatprep.subr.bf16.mxu0 %v723_v0  ;;  %534 = vmatprep.subr.bf16.mxu1 %v723_v0 }
  0x64   :  { %515 = vmatpush3.bf16.msra.mxu0 %v577_v11  ;;  %535 = vmatpush3.bf16.msra.mxu1 %v585_v17 }
  0x65   :  { %516 = vmatprep.subr.bf16.mxu0 %v723_v0  ;;  %536 = vmatprep.subr.bf16.mxu1 %v723_v0 }
  0x68   :  { %517 = vmatpush3.bf16.msra.mxu0 %v578_v13  ;;  %537 = vmatpush3.bf16.msra.mxu1 %v586_v18 }
  0x69   :  { %542 = vmatprep.subr.bf16.mxu0 %v723_v0 }
  0x6b   :  { %519 = vmatmul.mubr.bf16.vlgmr.msra.gmra.mrb[0].mxu0 %v99_v16 }
  0x6c   :  { %558 = vmatprep.mubr.msk.bf16.mxu0 %vm724_vm0, %v723_v0  ;;  %543 = vmatpush3.bf16.msra.mxu0 %v587_v19 }
  0x6d   :  { %544 = vmatprep.subr.bf16.mxu0 %v723_v0 }
  0x70   :  { %545 = vmatpush3.bf16.msra.mxu0 %v588_v20 }
  0x71   :  { %546 = vmatprep.subr.bf16.mxu0 %v723_v0 }
  0x74   :  { %547 = vmatpush3.bf16.msra.mxu0 %v589_v21 }
  0x75   :  { %548 = vmatprep.subr.bf16.mxu0 %v723_v0 }
  0x78   :  { %549 = vmatpush3.bf16.msra.mxu0 %v590_v22 }
  0x79   :  { %550 = vmatprep.subr.bf16.mxu0 %v723_v0 }
  0x7c   :  { %551 = vmatpush3.bf16.msra.mxu0 %v591_v23 }
  0x7d   :  { %552 = vmatprep.subr.bf16.mxu0 %v723_v0 }
  0x80   :  { %553 = vmatpush3.bf16.msra.mxu0 %v592_v24 }
  0x81   :  { %554 = vmatprep.subr.bf16.mxu0 %v723_v0 }
  0x84   :  { %555 = vmatpush3.bf16.msra.mxu0 %v593_v33 }
  0x85   :  { %556 = vmatprep.subr.bf16.mxu0 %v723_v0 }
  0x88   :  { %557 = vmatpush3.bf16.msra.mxu0 %v594_v34 }
 0x13e   :  { %v188_v26 = vpop.f32.mrb[0].mxu0 }
 0x13f   :  { %v189_v27 = vadd.f32 %v448_v25, %v188_v26  ;;  %v520_v28 = vpop.f32.mrb[1].mxu0 }
 0x140   :  { %v191_v29 = vpop.f32.mrb[2].mxu0 }
 0x141   :  { %v194_v30 = vmax.f32 %v189_v27, 0.0  ;;  %v521_v31 = vpop.f32.mrb[3].mxu0 }
 0x143   :  { %v212_v32 = vpack.c.bf16 %v194_v30, %v194_v30 }
 0x145   :  { %539 = vmatmul.mubr.bf16.vlgmr.msra.gmra.mrb[0].mxu1 %v212_v32 }
 0x218   :  { %v301_v36 = vpop.f32.mrb[0].mxu1 }
 0x219   :  { %v302_v37 = vadd.f32 %v457_v35, %v301_v36  ;;  %v540_v38 = vpop.f32.mrb[1].mxu1 }
 0x21a   :  { %v304_v39 = vpop.f32.mrb[2].mxu1 }
 0x21b   :  { %v307_v40 = vmax.f32 %v302_v37, 0.0  ;;  %v541_v41 = vpop.f32.mrb[3].mxu1 }
 0x21d   :  { %v325_v42 = vpack.c.bf16 %v307_v40, %v307_v40 }
 0x21f   :  { %559 = vmatmul.mubr.bf16.vlgmr.msra.gmra.mrb[4].mxu0 %v325_v42 }
 0x2f2   :  { %v414_v44 = vpop.f32.mrb[4].mxu0 }
 0x2f3   :  { %v415_v45 = vadd.f32 %v466_v43, %v414_v44  ;;  %v560_v46 = vpop.f32.mrb[5].mxu0 }
 0x2f4   :  { %v417_v47 = vpop.f32.mrb[6].mxu0 }
 0x2f5   :  { %420 = vmax.xlane.f32.xlu0 %v415_v45  ;;  %v561_v48 = vpop.f32.mrb[7].mxu0 }
 0x382   :  { %v421_v49 = vpop.xlane.xlu0 %420 }
 0x383   :  { %v422_v50 = vsub.f32 %v415_v45, %v421_v49 }
 0x385   :  { %v423_v51 = vmul.f32 1.442695, %v422_v50 }
 0x387   :  { %595 = vpow2.f32 %v423_v51 }
 0x391   :  { %v596_v52 = vpop.eup %595 }
 0x392   :  { %425 = vadd.xlane.f32.xlu0 %v596_v52 }
 0x41f   :  { %v426_v53 = vpop.xlane.xlu0 %425 }
 0x420   :  { %597 = vlog2.f32 %v426_v53 }
 0x42a   :  { %v598_v54 = vpop.eup %597 }
 0x42b   :  { %v428_v55 = vmul.f32 0.6931472, %v598_v54 }
 0x42d   :  { %v429_v56 = vsub.f32 %v422_v50, %v428_v55 }
 0x42f   :  { %430 = vst [vmem:[#allocation10] sm:$0xff] %v429_v56 }
 0x430   :  { %698 = shalt.err (!%p695_p8)
}
 0x431   :  { %s699_s8 = scalar_lea.hbm %s881_s7, 128 }
 0x432   :  { %p700_p9 = scmp.ne.s32.totalorder %s881_s7, %s699_s8  ;;  %p703_p10 = scmp.lt.u32.totalorder %s699_s8, %s881_s7 }
 0x434   :  { %p705_p11 = pnand %p703_p10, %p700_p9 }
 0x436   :  { %708 = shalt.err (!%p705_p11)
}
 0x437   :  { %440 = dma.vmem_to_hbm [thread:$0]  %s438_s28, 128, %s881_s7, [#allocation4]  }
 0x438   :  { %715 = dma.done.wait [#allocation4], 128  }
 0x439   :  { %716 = vsyncadd [#allocation4], 4294967168 }
 0x43a   :  { %444 = vsyncpa [#allocation3], 1 }
 0x43b   :  { %445 = vsyncpa [#allocation6], 1 }
 0x43c   :  { %446 = vsyncpa [#allocation9], 1 }
 0x43d   :  { %447 = vsyncpa [#allocation4], 1 }

// kernel: tpu_custom_call.1
= control target key start
LH: loop header
LB: loop body
LE: loop exit
PB: predicated region body
PF: predicated region fallthrough
CT: control target
= control target key end

     0   :  { %12 = vsyncpa [#allocation3], 0  ;;  %s874_s0 = inlined_call_operand.hbm [shape: f32[8,128], index: 0, kind: input, shape index: {}]   ;;  %s875_s1 = inlined_call_operand.hbm [shape: bf16[128,128], index: 1, kind: input, shape index: {}]   ;;  %s876_s2 = inlined_call_operand.vmem [shape: f32[1,128], index: 2, kind: input, shape index: {}]   ;;  %s877_s3 = inlined_call_operand.hbm [shape: bf16[128,128], index: 3, kind: input, shape index: {}]   ;;  %s878_s4 = inlined_call_operand.vmem [shape: f32[1,128], index: 4, kind: input, shape index: {}]   ;;  %s879_s5 = inlined_call_operand.hbm [shape: bf16[128,128], index: 5, kind: input, shape index: {}]   ;;  %s880_s6 = inlined_call_operand.vmem [shape: f32[1,128], index: 6, kind: input, shape index: {}]   ;;  %s881_s7 = inlined_call_operand.hbm [shape: f32[8,128], index: 7, kind: output, shape index: {}]  }
   0x1   :  { %13 = vsyncpa [#allocation6], 0 }
   0x2   :  { %14 = vsyncpa [#allocation9], 0 }
   0x3   :  { %15 = vsyncpa [#allocation4], 0  ;;  %s717_s24 = smov [#allocation5]   ;;  %s599_s28 = scalar_lea.hbm %s875_s1, 1024 }
   0x4   :  { %s31_s25 = sshll.u32 %s717_s24, 4  ;;  %p600_p0 = scmp.ne.s32.totalorder %s875_s1, %s599_s28  ;;  %s32_s25 = int_to_ptr.vmem [resolvable:$true] %s31_s25 }
   0x5   :  { %p603_p1 = scmp.lt.u32.totalorder %s599_s28, %s875_s1 }
   0x7   :  { %p605_p2 = pnand %p603_p1, %p600_p0 }
   0x9   :  { %608 = shalt.err (!%p605_p2)
}
   0xa   :  { %s609_s10 = scalar_lea.vmem %s32_s25, 1024  ;;  %p614_p4 = scmp.lt.s32.totalorder %s32_s25, %s32_s25 }
   0xb   :  { %p610_p3 = scmp.ne.s32.totalorder %s32_s25, %s609_s10  ;;  %p615_p5 = scmp.lt.s32.totalorder %s609_s10, %s609_s10 }
   0xd   :  { %p616_p6 = por %p615_p5, %p614_p4 }
   0xf   :  { %p617_p7 = pnand %p616_p6, %p610_p3 }
  0x11   :  { %620 = shalt.err (!%p617_p7)
}
  0x12   :  { %s718_s11 = smov 64   ;;  %s719_s12 = smov 4  }
  0x13   :  { %37 = dma.hbm_to_vmem [thread:$0]  %s875_s1, 1024, %s32_s25, [#allocation6], %s718_s11, %s718_s11, %s719_s12  }
  0x14   :  { %s720_s15 = smov [#allocation2]   ;;  %s721_s17 = smov [#allocation7]  }
  0x15   :  { %s22_s16 = sshll.u32 %s720_s15, 4  ;;  %s45_s18 = sshll.u32 %s721_s17, 4  ;;  %s23_s16 = int_to_ptr.vmem [resolvable:$true] %s22_s16  ;;  %s46_s18 = int_to_ptr.vmem [resolvable:$true] %s45_s18 }
  0x16   :  { %s621_s21 = scalar_lea.hbm %s874_s0, 128 }
  0x17   :  { %p622_p8 = scmp.ne.s32.totalorder %s874_s0, %s621_s21  ;;  %p625_p9 = scmp.lt.u32.totalorder %s621_s21, %s874_s0 }
  0x19   :  { %p627_p10 = pnand %p625_p9, %p622_p8 }
  0x1b   :  { %630 = shalt.err (!%p627_p10)
}
  0x1c   :  { %s631_s1 = scalar_lea.vmem %s23_s16, 128  ;;  %p636_p12 = scmp.lt.s32.totalorder %s23_s16, %s23_s16 }
  0x1d   :  { %p632_p11 = scmp.ne.s32.totalorder %s23_s16, %s631_s1  ;;  %p637_p13 = scmp.lt.s32.totalorder %s631_s1, %s631_s1 }
  0x1f   :  { %p638_p0 = por %p637_p13, %p636_p12 }
  0x21   :  { %p639_p1 = pnand %p638_p0, %p632_p11 }
  0x23   :  { %642 = shalt.err (!%p639_p1)
}
  0x24   :  { %25 = dma.hbm_to_vmem [thread:$0]  %s874_s0, 128, %s23_s16, [#allocation3]  }
  0x25   :  { %s643_s30 = scalar_lea.hbm %s877_s3, 1024 }
  0x26   :  { %p644_p2 = scmp.ne.s32.totalorder %s877_s3, %s643_s30  ;;  %p647_p3 = scmp.lt.u32.totalorder %s643_s30, %s877_s3 }
  0x28   :  { %p649_p4 = pnand %p647_p3, %p644_p2 }
  0x2a   :  { %652 = shalt.err (!%p649_p4)
}
  0x2b   :  { %s653_s14 = scalar_lea.vmem %s46_s18, 1024  ;;  %p658_p6 = scmp.lt.s32.totalorder %s46_s18, %s46_s18 }
  0x2c   :  { %p654_p5 = scmp.ne.s32.totalorder %s46_s18, %s653_s14  ;;  %p659_p7 = scmp.lt.s32.totalorder %s653_s14, %s653_s14 }
  0x2e   :  { %p660_p8 = por %p659_p7, %p658_p6 }
  0x30   :  { %p661_p9 = pnand %p660_p8, %p654_p5 }
  0x32   :  { %664 = shalt.err (!%p661_p9)
}
  0x33   :  { %51 = dma.hbm_to_vmem [thread:$0]  %s877_s3, 1024, %s46_s18, [#allocation6], %s718_s11, %s718_s11, %s719_s12  }
  0x34   :  { %s722_s16 = smov [#allocation8]   ;;  %s665_s21 = scalar_lea.hbm %s879_s5, 1024 }
  0x35   :  { %s59_s17 = sshll.u32 %s722_s16, 4  ;;  %p666_p10 = scmp.ne.s32.totalorder %s879_s5, %s665_s21  ;;  %s60_s17 = int_to_ptr.vmem [resolvable:$true] %s59_s17 }
  0x36   :  { %p669_p11 = scmp.lt.u32.totalorder %s665_s21, %s879_s5 }
  0x38   :  { %p671_p12 = pnand %p669_p11, %p666_p10 }
  0x3a   :  { %674 = shalt.err (!%p671_p12)
}
  0x3b   :  { %s675_s1 = scalar_lea.vmem %s60_s17, 1024  ;;  %p680_p0 = scmp.lt.s32.totalorder %s60_s17, %s60_s17 }
  0x3c   :  { %p676_p13 = scmp.ne.s32.totalorder %s60_s17, %s675_s1  ;;  %p681_p1 = scmp.lt.s32.totalorder %s675_s1, %s675_s1 }
  0x3e   :  { %p682_p2 = por %p681_p1, %p680_p0 }
  0x40   :  { %p683_p3 = pnand %p682_p2, %p676_p13 }
  0x42   :  { %686 = shalt.err (!%p683_p3)
}
  0x43   :  { %65 = dma.hbm_to_vmem [thread:$0]  %s879_s5, 1024, %s60_s17, [#allocation9], %s718_s11, %s718_s11, %s719_s12  }
  0x44   :  { %709 = dma.done.wait [#allocation3], 128  }
  0x45   :  { %710 = vsyncadd [#allocation3], 4294967168 }
  0x46   :  { %711 = dma.done.wait [#allocation6], 2048  }
  0x47   :  { %712 = vsyncadd [#allocation6], 4294965248 }
  0x48   :  { %713 = dma.done.wait [#allocation9], 1024  }
  0x49   :  { %714 = vsyncadd [#allocation9], 4294966272  ;;  %v723_v0 = vmov 0.0   ;;  %vm724_vm0 = vmmov 0   ;;  %v571_v1 = vld [vmem:[#allocation5] sm:$0xff]   ;;  %v572_v2 = vld [vmem:[#allocation5 + $0x8] sm:$0xff]  }
  0x4a   :  { %502 = vmatprep.subr.bf16.mxu0 %v723_v0  ;;  %518 = vmatprep.mubr.msk.bf16.mxu0 %vm724_vm0, %v723_v0  ;;  %v573_v3 = vld [vmem:[#allocation5 + $0x10] sm:$0xff]   ;;  %v579_v4 = vld [vmem:[#allocation7] sm:$0xff]   ;;  %v574_v5 = vld [vmem:[#allocation5 + $0x18] sm:$0xff]  }
  0x4b   :  { %522 = vmatprep.subr.bf16.mxu1 %v723_v0  ;;  %538 = vmatprep.mubr.msk.bf16.mxu1 %vm724_vm0, %v723_v0  ;;  %v580_v6 = vld [vmem:[#allocation7 + $0x8] sm:$0xff]   ;;  %v575_v7 = vld [vmem:[#allocation5 + $0x20] sm:$0xff]   ;;  %v581_v8 = vld [vmem:[#allocation7 + $0x10] sm:$0xff]  }
  0x4c   :  { %503 = vmatpush3.bf16.msra.mxu0 %v571_v1  ;;  %523 = vmatpush3.bf16.msra.mxu1 %v579_v4  ;;  %v576_v9 = vld [vmem:[#allocation5 + $0x28] sm:$0xff]   ;;  %v582_v10 = vld [vmem:[#allocation7 + $0x18] sm:$0xff]   ;;  %v577_v11 = vld [vmem:[#allocation5 + $0x30] sm:$0xff]  }
  0x4d   :  { %504 = vmatprep.subr.bf16.mxu0 %v723_v0  ;;  %524 = vmatprep.subr.bf16.mxu1 %v723_v0  ;;  %v583_v12 = vld [vmem:[#allocation7 + $0x20] sm:$0xff]   ;;  %v578_v13 = vld [vmem:[#allocation5 + $0x38] sm:$0xff]   ;;  %v584_v15 = vld [vmem:[#allocation7 + $0x28] sm:$0xff]  }
  0x4e   :  { %v81_v14 = vld [vmem:[#allocation2] sm:$0xff]  ;;  %v585_v17 = vld [vmem:[#allocation7 + $0x30] sm:$0xff]   ;;  %v587_v19 = vld [vmem:[#allocation8] sm:$0xff]  }
  0x4f   :  { %v99_v16 = vpack.c.bf16 %v81_v14, %v81_v14  ;;  %v586_v18 = vld [vmem:[#allocation7 + $0x38] sm:$0xff]   ;;  %v588_v20 = vld [vmem:[#allocation8 + $0x8] sm:$0xff]   ;;  %v589_v21 = vld [vmem:[#allocation8 + $0x10] sm:$0xff]  }
  0x50   :  { %505 = vmatpush3.bf16.msra.mxu0 %v572_v2  ;;  %525 = vmatpush3.bf16.msra.mxu1 %v580_v6  ;;  %v590_v22 = vld [vmem:[#allocation8 + $0x18] sm:$0xff]   ;;  %v591_v23 = vld [vmem:[#allocation8 + $0x20] sm:$0xff]   ;;  %v592_v24 = vld [vmem:[#allocation8 + $0x28] sm:$0xff]  }
  0x51   :  { %506 = vmatprep.subr.bf16.mxu0 %v723_v0  ;;  %526 = vmatprep.subr.bf16.mxu1 %v723_v0  ;;  %v448_v25 = vld [vmem:[%s876_s2] ss:$0 sm:$0xff]  ;;  %v593_v33 = vld [vmem:[#allocation8 + $0x30] sm:$0xff]  }
  0x52   :  { %v594_v34 = vld [vmem:[#allocation8 + $0x38] sm:$0xff]  }
  0x53   :  { %v457_v35 = vld [vmem:[%s878_s4] ss:$0 sm:$0xff]  ;;  %s725_s4 = smov [#allocation10]  }
  0x54   :  { %507 = vmatpush3.bf16.msra.mxu0 %v573_v3  ;;  %527 = vmatpush3.bf16.msra.mxu1 %v581_v8  ;;  %v466_v43 = vld [vmem:[%s880_s6] ss:$0 sm:$0xff]  ;;  %s437_s28 = sshll.u32 %s725_s4, 4  ;;  %s438_s28 = int_to_ptr.vmem [resolvable:$true] %s437_s28 }
  0x55   :  { %508 = vmatprep.subr.bf16.mxu0 %v723_v0  ;;  %528 = vmatprep.subr.bf16.mxu1 %v723_v0  ;;  %s687_s6 = scalar_lea.vmem %s438_s28, 128  ;;  %p692_p5 = scmp.lt.s32.totalorder %s438_s28, %s438_s28 }
  0x56   :  { %p688_p4 = scmp.ne.s32.totalorder %s438_s28, %s687_s6  ;;  %p693_p6 = scmp.lt.s32.totalorder %s687_s6, %s687_s6 }
  0x58   :  { %509 = vmatpush3.bf16.msra.mxu0 %v574_v5  ;;  %529 = vmatpush3.bf16.msra.mxu1 %v582_v10  ;;  %p694_p7 = por %p693_p6, %p692_p5 }
  0x59   :  { %510 = vmatprep.subr.bf16.mxu0 %v723_v0  ;;  %530 = vmatprep.subr.bf16.mxu1 %v723_v0 }
  0x5a   :  { %p695_p8 = pnand %p694_p7, %p688_p4 }
  0x5c   :  { %511 = vmatpush3.bf16.msra.mxu0 %v575_v7  ;;  %531 = vmatpush3.bf16.msra.mxu1 %v583_v12 }
  0x5d   :  { %512 = vmatprep.subr.bf16.mxu0 %v723_v0  ;;  %532 = vmatprep.subr.bf16.mxu1 %v723_v0 }
  0x60   :  { %513 = vmatpush3.bf16.msra.mxu0 %v576_v9  ;;  %533 = vmatpush3.bf16.msra.mxu1 %v584_v15 }
  0x61   :  { %514 = vmatprep.subr.bf16.mxu0 %v723_v0  ;;  %534 = vmatprep.subr.bf16.mxu1 %v723_v0 }
  0x64   :  { %515 = vmatpush3.bf16.msra.mxu0 %v577_v11  ;;  %535 = vmatpush3.bf16.msra.mxu1 %v585_v17 }
  0x65   :  { %516 = vmatprep.subr.bf16.mxu0 %v723_v0  ;;  %536 = vmatprep.subr.bf16.mxu1 %v723_v0 }
  0x68   :  { %517 = vmatpush3.bf16.msra.mxu0 %v578_v13  ;;  %537 = vmatpush3.bf16.msra.mxu1 %v586_v18 }
  0x69   :  { %542 = vmatprep.subr.bf16.mxu0 %v723_v0 }
  0x6b   :  { %519 = vmatmul.mubr.bf16.vlgmr.msra.gmra.mrb[0].mxu0 %v99_v16 }
  0x6c   :  { %558 = vmatprep.mubr.msk.bf16.mxu0 %vm724_vm0, %v723_v0  ;;  %543 = vmatpush3.bf16.msra.mxu0 %v587_v19 }
  0x6d   :  { %544 = vmatprep.subr.bf16.mxu0 %v723_v0 }
  0x70   :  { %545 = vmatpush3.bf16.msra.mxu0 %v588_v20 }
  0x71   :  { %546 = vmatprep.subr.bf16.mxu0 %v723_v0 }
  0x74   :  { %547 = vmatpush3.bf16.msra.mxu0 %v589_v21 }
  0x75   :  { %548 = vmatprep.subr.bf16.mxu0 %v723_v0 }
  0x78   :  { %549 = vmatpush3.bf16.msra.mxu0 %v590_v22 }
  0x79   :  { %550 = vmatprep.subr.bf16.mxu0 %v723_v0 }
  0x7c   :  { %551 = vmatpush3.bf16.msra.mxu0 %v591_v23 }
  0x7d   :  { %552 = vmatprep.subr.bf16.mxu0 %v723_v0 }
  0x80   :  { %553 = vmatpush3.bf16.msra.mxu0 %v592_v24 }
  0x81   :  { %554 = vmatprep.subr.bf16.mxu0 %v723_v0 }
  0x84   :  { %555 = vmatpush3.bf16.msra.mxu0 %v593_v33 }
  0x85   :  { %556 = vmatprep.subr.bf16.mxu0 %v723_v0 }
  0x88   :  { %557 = vmatpush3.bf16.msra.mxu0 %v594_v34 }
 0x13e   :  { %v188_v26 = vpop.f32.mrb[0].mxu0 }
 0x13f   :  { %v189_v27 = vadd.f32 %v448_v25, %v188_v26  ;;  %v520_v28 = vpop.f32.mrb[1].mxu0 }
 0x140   :  { %v191_v29 = vpop.f32.mrb[2].mxu0 }
 0x141   :  { %v194_v30 = vmax.f32 %v189_v27, 0.0  ;;  %v521_v31 = vpop.f32.mrb[3].mxu0 }
 0x143   :  { %v212_v32 = vpack.c.bf16 %v194_v30, %v194_v30 }
 0x145   :  { %539 = vmatmul.mubr.bf16.vlgmr.msra.gmra.mrb[0].mxu1 %v212_v32 }
 0x218   :  { %v301_v36 = vpop.f32.mrb[0].mxu1 }
 0x219   :  { %v302_v37 = vadd.f32 %v457_v35, %v301_v36  ;;  %v540_v38 = vpop.f32.mrb[1].mxu1 }
 0x21a   :  { %v304_v39 = vpop.f32.mrb[2].mxu1 }
 0x21b   :  { %v307_v40 = vmax.f32 %v302_v37, 0.0  ;;  %v541_v41 = vpop.f32.mrb[3].mxu1 }
 0x21d   :  { %v325_v42 = vpack.c.bf16 %v307_v40, %v307_v40 }
 0x21f   :  { %559 = vmatmul.mubr.bf16.vlgmr.msra.gmra.mrb[4].mxu0 %v325_v42 }
 0x2f2   :  { %v414_v44 = vpop.f32.mrb[4].mxu0 }
 0x2f3   :  { %v415_v45 = vadd.f32 %v466_v43, %v414_v44  ;;  %v560_v46 = vpop.f32.mrb[5].mxu0 }
 0x2f4   :  { %v417_v47 = vpop.f32.mrb[6].mxu0 }
 0x2f5   :  { %420 = vmax.xlane.f32.xlu0 %v415_v45  ;;  %v561_v48 = vpop.f32.mrb[7].mxu0 }
 0x382   :  { %v421_v49 = vpop.xlane.xlu0 %420 }
 0x383   :  { %v422_v50 = vsub.f32 %v415_v45, %v421_v49 }
 0x385   :  { %v423_v51 = vmul.f32 1.442695, %v422_v50 }
 0x387   :  { %595 = vpow2.f32 %v423_v51 }
 0x391   :  { %v596_v52 = vpop.eup %595 }
 0x392   :  { %425 = vadd.xlane.f32.xlu0 %v596_v52 }
 0x41f   :  { %v426_v53 = vpop.xlane.xlu0 %425 }
 0x420   :  { %597 = vlog2.f32 %v426_v53 }
 0x42a   :  { %v598_v54 = vpop.eup %597 }
 0x42b   :  { %v428_v55 = vmul.f32 0.6931472, %v598_v54 }
 0x42d   :  { %v429_v56 = vsub.f32 %v422_v50, %v428_v55 }
 0x42f   :  { %430 = vst [vmem:[#allocation10] sm:$0xff] %v429_v56 }
 0x430   :  { %698 = shalt.err (!%p695_p8)
}
 0x431   :  { %s699_s8 = scalar_lea.hbm %s881_s7, 128 }
 0x432   :  { %p700_p9 = scmp.ne.s32.totalorder %s881_s7, %s699_s8  ;;  %p703_p10 = scmp.lt.u32.totalorder %s699_s8, %s881_s7 }
 0x434   :  { %p705_p11 = pnand %p703_p10, %p700_p9 }
 0x436   :  { %708 = shalt.err (!%p705_p11)
}
 0x437   :  { %440 = dma.vmem_to_hbm [thread:$0]  %s438_s28, 128, %s881_s7, [#allocation4]  }
 0x438   :  { %715 = dma.done.wait [#allocation4], 128  }
 0x439   :  { %716 = vsyncadd [#allocation4], 4294967168 }
 0x43a   :  { %444 = vsyncpa [#allocation3], 1 }
 0x43b   :  { %445 = vsyncpa [#allocation6], 1 }
 0x43c   :  { %446 = vsyncpa [#allocation9], 1 }
 0x43d   :  { %447 = vsyncpa [#allocation4], 1 }

</bundles_post_ra>
